<compile_context>
chip_gen: v7x
topology: tpu7x:2x2x1
jax: 0.10.0
libtpu: 0.0.40
codegen_flags: <defaults>
</compile_context>

<pallas_src>
import functools

import jax
import jax.numpy as jnp
from jax import lax
from jax.experimental import pallas as pl
from jax.experimental.pallas import tpu as pltpu

_EPS = 1e-8


# ---------------------------------------------------------------------------
# Pallas kernel
# ---------------------------------------------------------------------------
def _pixelnorm_kernel(x_ref, o_ref, *, reduce_axis):
    # Compute in f32 regardless of storage dtype.
    xf = x_ref[...].astype(jnp.float32)
    mean_sq = jnp.mean(xf * xf, axis=reduce_axis, keepdims=True)  # XLU reduce
    inv = lax.rsqrt(mean_sq + _EPS)                               # EUP rsqrt
    # Re-read the (narrow) input buffer for the final multiply rather than
    # keeping the full f32 upcast live across both uses (saves VMEM for bf16
    # tiles, which matters under v7x's 64 MiB VMEM).
    o_ref[...] = (x_ref[...].astype(jnp.float32) * inv).astype(o_ref.dtype)


# ---------------------------------------------------------------------------
# Tiling policy
# ---------------------------------------------------------------------------
def _tpu_budgets():
    """(per-DMA-buffer byte budget, scoped-VMEM cap, force-even-grid) by generation."""
    try:
        vmem_cap = int(pltpu.get_tpu_info().vmem_capacity_bytes)
    except Exception:
        vmem_cap = 64 << 20  # conservative (v7x-sized) fallback
    if vmem_cap <= (64 << 20):
        # v7x: 64 MiB VMEM/TC, 2 TCs share HBM -> modest tiles, balanced grid.
        return 6 << 20, 56 << 20, True
    # v5e / v6e: 128 MiB physical VMEM, single TensorCore per chip.
    return 10 << 20, 88 << 20, False


def _cdiv(a, b):
    return -(-a // b)


def _choose_tiles(M, row_bytes_dma, budget, two_cores):
    """Balanced leading-dim tile.

    The byte budget alone bounds the tile size; rows are then split so every
    grid step does near-equal work, rounded to a multiple of 32 sublanes
    (covers f32/bf16/int8 packing).  On v7x the step count is forced even
    (>= 2) when there is enough work so both TensorCores stay busy.
    """
    tm_max = max(1, budget // max(row_bytes_dma, 1))
    n = _cdiv(M, tm_max)
    if two_cores and M >= 64:
        n = max(n, 2)
        if n % 2:
            n += 1
    if n <= 1:
        return M, 1
    tm = _cdiv(M, n)
    tm = min(((tm + 31) // 32) * 32, M)
    return tm, _cdiv(M, tm)


# ---------------------------------------------------------------------------
# Wrapper
# ---------------------------------------------------------------------------
def pixel_norm(x, dim=2):
    """Pallas implementation of PixelNorm.forward(x) (reduction over `dim`)."""
    axis = dim if dim >= 0 else dim + x.ndim
    if not (0 <= axis < x.ndim):
        raise ValueError(f"reduction dim {dim} out of range for rank-{x.ndim} input")

    shape = x.shape
    itemsize = jnp.dtype(x.dtype).itemsize
    budget, vmem_cap_limit, two_cores = _tpu_budgets()

    if axis == x.ndim - 1:
        # Reduction axis -> lanes.
        C = shape[-1]
        xk = x.reshape(-1, C)
        M = xk.shape[0]
        row_elems = C
        block_trailing = (C,)
        reduce_axis = -1
        idx_map = lambda i: (i, 0)
        groups_per_row = 1
    else:
        # Keep the original layout (no transpose round-trip): fold dims before
        # `axis` into the grid axis and dims after it into the lane axis, then
        # reduce along the sublane axis in-kernel.
        pre = 1
        for d in shape[:axis]:
            pre *= d
        C = shape[axis]
        suf = 1
        for d in shape[axis + 1:]:
            suf *= d
        xk = x.reshape(pre, C, suf)
        M = pre
        row_elems = C * suf
        block_trailing = (C, suf)
        reduce_axis = -2
        idx_map = lambda i: (i, 0, 0)
        groups_per_row = suf

    row_bytes_dma = row_elems * itemsize
    tm, nsteps = _choose_tiles(M, row_bytes_dma, budget, two_cores)

    # VMEM: 2x double-buffered input + 2x output DMA tiles (storage dtype) plus
    # the in-kernel f32 temporaries, plus headroom, clamped per generation.
    tile_dma_bytes = tm * row_elems * itemsize
    tile_f32_bytes = tm * row_elems * 4
    vmem_need = 4 * tile_dma_bytes + 2 * tile_f32_bytes + (4 << 20)
    vmem_limit = int(min(max(vmem_need, 16 << 20), vmem_cap_limit))

    kernel = functools.partial(_pixelnorm_kernel, reduce_axis=reduce_axis)
    block = (tm,) + block_trailing

    out = pl.pallas_call(
        kernel,
        out_shape=jax.ShapeDtypeStruct(xk.shape, xk.dtype),
        grid_spec=pltpu.PrefetchScalarGridSpec(
            num_scalar_prefetch=0,
            grid=(nsteps,),
            in_specs=[pl.BlockSpec(block, idx_map)],
            out_specs=pl.BlockSpec(block, idx_map),
        ),
        compiler_params=pltpu.CompilerParams(
            dimension_semantics=("parallel",),
            vmem_limit_bytes=vmem_limit,
        ),
        cost_estimate=pl.CostEstimate(
            flops=3 * M * row_elems,
            transcendentals=M * groups_per_row,
            bytes_accessed=2 * M * row_elems * itemsize,
        ),
    )(xk)

    return out.reshape(shape)


# ---------------------------------------------------------------------------
# Reference (plain JAX, f32 internal math) for sanity checks
# ---------------------------------------------------------------------------
def _ref_pixel_norm(x, dim=2):
    xf = x.astype(jnp.float32)
    y = xf * lax.rsqrt(jnp.mean(jnp.square(xf), axis=dim, keepdims=True) + _EPS)
    return y.astype(x.dtype)


if __name__ == "__main__":
    key = jax.random.PRNGKey(0)
    k1, k2, k3 = jax.random.split(key, 3)

    tests = [
        # Canonical ViT usage: (batch, tokens, hidden), reduce over dim=2.
        ("vit_small_f32", jax.random.normal(k1, (2, 8, 32), dtype=jnp.float32), 1e-5),
        # Ragged row count (B*197 style) in the common ViT dtype (bf16).
        ("vit_ragged_bf16",
         jax.random.normal(k2, (4, 197, 256), dtype=jnp.float32).astype(jnp.bfloat16),
         2e-2),
        # dim=2 is NOT the last axis: exercises the no-transpose sublane-reduce path.
        ("mid_axis_4d", jax.random.normal(k3, (2, 4, 16, 8), dtype=jnp.float32), 1e-5),
    ]

    ok = True
    for name, x, tol in tests:
        y = pixel_norm(x, dim=2)
        jax.block_until_ready(y)
        y_ref = _ref_pixel_norm(x, dim=2)
        if y.shape != x.shape or not jnp.allclose(
            y.astype(jnp.float32), y_ref.astype(jnp.float32), atol=tol, rtol=tol
        ):
            ok = False
            err = float(jnp.max(jnp.abs(y.astype(jnp.float32) - y_ref.astype(jnp.float32))))
            print(f"MISMATCH for {name}: max abs err {err}")

    if ok:
        print("KERNEL_OK")
</pallas_src>

<mosaic_0001>
module attributes {stable_mosaic.version = 11 : i64} {
  func.func @_pixelnorm_kernel(%arg0: i32, %arg1: memref<16x32xf32, #tpu.memory_space<vmem>>, %arg2: memref<16x32xf32, #tpu.memory_space<vmem>>) attributes {dimension_semantics = [#tpu.dimension_semantics<parallel>], iteration_bounds = array<i64: 1>, scalar_prefetch = 0 : i64, scratch_operands = 0 : i64, tpu.core_type = #tpu.core_type<tc>, window_params = [{transform_indices = @transform_0, window_bounds = array<i64: 16, 32>}, {transform_indices = @transform_1, window_bounds = array<i64: 16, 32>}]} {
    %c0 = arith.constant 0 : index
    %c0_0 = arith.constant 0 : index
    %0 = vector.load %arg1[%c0, %c0_0] : memref<16x32xf32, #tpu.memory_space<vmem>>, vector<16x32xf32>
    %1 = arith.mulf %0, %0 : vector<16x32xf32>
    %cst = arith.constant dense<0.000000e+00> : vector<16xf32>
    %2 = vector.multi_reduction <add>, %1, %cst [1] : vector<16x32xf32> to vector<16xf32>
    %3 = vector.shape_cast %2 : vector<16xf32> to vector<16x1xf32>
    %cst_1 = arith.constant 3.200000e+01 : f32
    %4 = vector.broadcast %cst_1 : f32 to vector<16x1xf32>
    %5 = arith.divf %3, %4 : vector<16x1xf32>
    %cst_2 = arith.constant 9.99999993E-9 : f32
    %6 = vector.broadcast %cst_2 : f32 to vector<16x1xf32>
    %7 = arith.addf %5, %6 : vector<16x1xf32>
    %8 = math.rsqrt %7 : vector<16x1xf32>
    %c0_3 = arith.constant 0 : index
    %c0_4 = arith.constant 0 : index
    %9 = vector.load %arg1[%c0_3, %c0_4] : memref<16x32xf32, #tpu.memory_space<vmem>>, vector<16x32xf32>
    %10 = vector.broadcast %8 : vector<16x1xf32> to vector<16x32xf32>
    %11 = arith.mulf %9, %10 : vector<16x32xf32>
    %c0_5 = arith.constant 0 : index
    %c0_6 = arith.constant 0 : index
    %12 = vector.load %arg2[%c0_5, %c0_6] : memref<16x32xf32, #tpu.memory_space<vmem>>, vector<16x32xf32>
    tpu.vector_store %arg2[%c0_5, %c0_6], %11 {strides = array<i32>} : memref<16x32xf32, #tpu.memory_space<vmem>>, vector<16x32xf32>,
    return
  }
  func.func @transform_0(%arg0: i32) -> (i32, i32) {
    %c0_i32 = arith.constant 0 : i32
    %c0_i32_0 = arith.constant 0 : i32
    return %arg0, %c0_i32 : i32, i32
  }
  func.func @transform_1(%arg0: i32) -> (i32, i32) {
    %c0_i32 = arith.constant 0 : i32
    %c0_i32_0 = arith.constant 0 : i32
    return %arg0, %c0_i32 : i32, i32
  }
}

</mosaic_0001>

<bundles_post_ra>
// kernel: tpu_custom_call.1
= control target key start
LH: loop header
LB: loop body
LE: loop exit
PB: predicated region body
PF: predicated region fallthrough
CT: control target
= control target key end

     0   :  { %6 = vsyncpa [#allocation3], 0  ;;  %s166_s0 = inlined_call_operand.hbm [shape: f32[16,32], index: 0, kind: input, shape index: {}]   ;;  %s167_s1 = inlined_call_operand.hbm [shape: f32[16,32], index: 1, kind: output, shape index: {}]  }
   0x1   :  { %7 = vsyncpa [#allocation4], 0  ;;  %s118_s6 = smov [#allocation2]   ;;  %s70_s10 = scalar_lea.hbm %s166_s0, 256 }
   0x2   :  { %s13_s7 = sshll.u32 %s118_s6, 4  ;;  %p71_p0 = scmp.ne.s32.totalorder %s166_s0, %s70_s10  ;;  %s14_s7 = int_to_ptr.vmem [resolvable:$true] %s13_s7 }
   0x3   :  { %p74_p1 = scmp.lt.u32.totalorder %s70_s10, %s166_s0 }
   0x5   :  { %p76_p2 = pnand %p74_p1, %p71_p0 }
   0x7   :  { %79 = shalt.err (!%p76_p2)
}
   0x8   :  { %s80_s15 = scalar_lea.vmem %s14_s7, 256  ;;  %p85_p4 = scmp.lt.s32.totalorder %s14_s7, %s14_s7 }
   0x9   :  { %p81_p3 = scmp.ne.s32.totalorder %s14_s7, %s80_s15  ;;  %p86_p5 = scmp.lt.s32.totalorder %s80_s15, %s80_s15 }
   0xb   :  { %p87_p6 = por %p86_p5, %p85_p4 }
   0xd   :  { %p88_p7 = pnand %p87_p6, %p81_p3 }
   0xf   :  { %91 = shalt.err (!%p88_p7)
}
  0x10   :  { %s119_s16 = smov 128   ;;  %s120_s17 = smov 8  }
  0x11   :  { %19 = dma.hbm_to_vmem [thread:$0]  %s166_s0, 256, %s14_s7, [#allocation3], %s119_s16, %s119_s16, %s120_s17  }
  0x12   :  { %114 = dma.done.wait [#allocation3], 256  }
  0x13   :  { %115 = vsyncadd [#allocation3], 4294967040  ;;  %v23_v0 = vld [vmem:[#allocation2] sm:$0xff]  ;;  %vm27_vm0 = vcmask 261120   ;;  %v24_v1 = vld [vmem:[#allocation2 + $0x8] sm:$0xff]  ;;  %s121_s0 = smov [#allocation5]  }
  0x14   :  { %v25_v2 = vmul.f32 %v23_v0, %v23_v0  ;;  %v26_v3 = vmul.f32 %v24_v1, %v24_v1  ;;  %s50_s20 = sshll.u32 %s121_s0, 4  ;;  %s51_s20 = int_to_ptr.vmem [resolvable:$true] %s50_s20 }
  0x15   :  { %s92_s21 = scalar_lea.vmem %s51_s20, 256  ;;  %p97_p9 = scmp.lt.s32.totalorder %s51_s20, %s51_s20 }
  0x16   :  { %v28_v4 = vsel %vm27_vm0, %v25_v2, 0.0  ;;  %v31_v5 = vsel %vm27_vm0, %v26_v3, 0.0  ;;  %p93_p8 = scmp.ne.s32.totalorder %s51_s20, %s92_s21  ;;  %p98_p10 = scmp.lt.s32.totalorder %s92_s21, %s92_s21 }
  0x17   :  { %29 = vadd.xlane.f32.xlu0 %v28_v4 }
  0x18   :  { %p99_p11 = por %p98_p10, %p97_p9 }
  0x1a   :  { %p100_p12 = pnand %p99_p11, %p93_p8 }
  0x1b   :  { %32 = vadd.xlane.f32.xlu0 %v31_v5 }
  0xa4   :  { %v30_v6 = vpop.xlane.xlu0 %29 }
  0xa5   :  { %v35_v7 = vmul.f32 0.03125, %v30_v6 }
  0xa7   :  { %v37_v8 = vadd.f32 1e-08, %v35_v7 }
  0xa8   :  { %v33_v9 = vpop.xlane.xlu0 %32 }
  0xa9   :  { %66 = vrsqrt.f32 %v37_v8  ;;  %v36_v10 = vmul.f32 0.03125, %v33_v9 }
  0xab   :  { %v38_v11 = vadd.f32 1e-08, %v36_v10 }
  0xad   :  { %68 = vrsqrt.f32 %v38_v11 }
  0xb3   :  { %v67_v12 = vpop.eup %66 }
  0xb4   :  { %v41_v13 = vmul.f32 %v67_v12, %v23_v0 }
  0xb6   :  { %43 = vst.msk [vmem:[#allocation5] sm:$0xff] %vm27_vm0, %v41_v13 }
  0xb7   :  { %v69_v14 = vpop.eup %68 }
  0xb8   :  { %v42_v15 = vmul.f32 %v69_v14, %v24_v1 }
  0xba   :  { %44 = vst.msk [vmem:[#allocation5 + $0x8] sm:$0xff] %vm27_vm0, %v42_v15 }
  0xbb   :  { %103 = shalt.err (!%p100_p12)
}
  0xbc   :  { %s104_s24 = scalar_lea.hbm %s167_s1, 256 }
  0xbd   :  { %p105_p13 = scmp.ne.s32.totalorder %s167_s1, %s104_s24  ;;  %p108_p0 = scmp.lt.u32.totalorder %s104_s24, %s167_s1 }
  0xbf   :  { %p110_p1 = pnand %p108_p0, %p105_p13 }
  0xc1   :  { %113 = shalt.err (!%p110_p1)
}
  0xc2   :  { %56 = dma.vmem_to_hbm [thread:$0]  %s51_s20, 256, %s167_s1, [#allocation4], %s119_s16, %s119_s16, %s120_s17  }
  0xc3   :  { %116 = dma.done.wait [#allocation4], 256  }
  0xc4   :  { %117 = vsyncadd [#allocation4], 4294967040 }
  0xc5   :  { %60 = vsyncpa [#allocation3], 1 }
  0xc6   :  { %61 = vsyncpa [#allocation4], 1 }

</bundles_post_ra>
